<compile_context>
chip_gen: v7x
topology: tpu7x:2x2x1
jax: 0.10.0
libtpu: 0.0.40
codegen_flags: <defaults>
</compile_context>

<pallas_src>
import jax
import jax.numpy as jnp
from jax.experimental import pallas as pl
from jax.experimental.pallas import tpu as pltpu


def _round_up(x, m):
    return ((x + m - 1) // m) * m


def _hardsigmoid(v):
    # v2 = v + 3 ; v3 = clamp_min(v2, 0) ; v4 = clamp_max(v3, 6) ; v5 = v4 / 6
    return jnp.minimum(jnp.maximum(v + 3.0, 0.0), 6.0) * (1.0 / 6.0)


def _linear_hsig_kernel(x_ref, w_ref, b_ref, o_ref, acc_ref):
    """One (tm, tn) output tile; K is the innermost (reduction) grid axis.

    x_ref:   (tm, tk)  activations
    w_ref:   (tk, tn)  pre-transposed weight tile (MXU-native K-major)
    b_ref:   (1,  tn)  bias row for this j tile (f32)
    o_ref:   (tm, tn)  output tile
    acc_ref: (tm, tn)  f32 VMEM accumulator (persists across k steps)
    """
    k = pl.program_id(2)

    @pl.when(k == 0)
    def _():
        acc_ref[...] = jnp.zeros_like(acc_ref)

    acc_ref[...] += jnp.dot(x_ref[...], w_ref[...],
                            preferred_element_type=jnp.float32)

    @pl.when(k == pl.num_programs(2) - 1)
    def _():
        v = acc_ref[...] + b_ref[...]          # bias only on the final K step
        o_ref[...] = _hardsigmoid(v).astype(o_ref.dtype)


class LinearHardSigmoid:
    """Pallas-fused equivalent of `nn.Linear(IN, OUT)` + hardsigmoid epilogue.

    Weight/bias prep (cast, zero-pad, transpose to (IN, OUT)) happens once at
    construction, so repeated calls pay only for the activation side.
    """

    def __init__(self, w, b, *, tm=256, tn=512, tk=1024, compute_dtype=None,
                 small_problem_flops=1 << 20):
        OUT, IN = w.shape
        assert b.shape == (OUT,)
        self.in_features = IN
        self.out_features = OUT
        self.small_problem_flops = small_problem_flops

        # torch-layout copies kept for the small-problem bypass.
        self.w = w
        self.b = b

        self._cdt = compute_dtype if compute_dtype is not None else w.dtype
        itemsize = jnp.dtype(self._cdt).itemsize
        # bf16 packs 2 rows per sublane -> round sublane dims to 16, f32 to 8.
        self._sublane = 8 * max(1, 4 // itemsize)

        # Tile sizes, shrunk toward the (padded) problem size but kept
        # (sublane, 128)-aligned.
        self.tk = min(tk, _round_up(IN, 128))
        self.tn = min(tn, _round_up(OUT, 128))
        self.tm = tm

        INp = _round_up(IN, self.tk)      # tk | INp  -> no ragged K tiles
        OUTp = _round_up(OUT, self.tn)    # tn | OUTp -> no ragged N tiles
        self.INp, self.OUTp = INp, OUTp

        # --- One-time parameter prep (hoisted out of the per-call path) -----
        wp = w.astype(self._cdt)
        wp = jnp.pad(wp, ((0, OUTp - OUT), (0, INp - IN)))
        self.w_kn = jnp.asarray(wp.T)                              # (INp, OUTp)
        bp = b.astype(jnp.float32).reshape(1, OUT)
        self.b_row = jnp.pad(bp, ((0, 0), (0, OUTp - OUT)))        # (1, OUTp)

    def __call__(self, x, *, force_pallas=False):
        B, IN = x.shape
        assert IN == self.in_features
        OUT = self.out_features
        out_dtype = x.dtype

        # Small-problem bypass: at toy sizes XLA's fused dot+clamp beats the
        # pad/slice + pallas_call dispatch overhead.
        if (not force_pallas
                and 2 * B * OUT * IN < self.small_problem_flops):
            return _hardsigmoid(x @ self.w.T + self.b).astype(out_dtype)

        cdt = self._cdt
        sub = self._sublane
        INp, OUTp = self.INp, self.OUTp
        tk, tn = self.tk, self.tn

        # Pad batch only to the sublane multiple; ragged last M tiles are fine
        # (out-of-range rows are dropped on the output store).
        Bp = _round_up(B, sub)
        tm = min(self.tm, Bp)
        grid_m = pl.cdiv(Bp, tm)

        # v7x has 2 TensorCores sharded over the parallel grid axes; if the
        # batch axis gives only one block, split OUT so both cores get work.
        if grid_m == 1 and OUTp // tn == 1 and OUTp >= 256:
            tn_half = _round_up(OUTp // 2, 128)
            if OUTp % tn_half == 0:
                tn = tn_half
        grid_n = OUTp // tn
        grid_k = INp // tk
        grid = (grid_m, grid_n, grid_k)

        xp = x.astype(cdt)
        if (Bp, INp) != (B, IN):
            # K padding must be zeros (contributes 0 to the dot).
            xp = jnp.pad(xp, ((0, Bp - B), (0, INp - IN)))

        dsize = jnp.dtype(cdt).itemsize
        osize = jnp.dtype(out_dtype).itemsize
        vmem_need = (2 * (tm * tk + tk * tn) * dsize    # double-buffered x, w
                     + 2 * tm * tn * osize              # double-buffered out
                     + tm * tn * 4                      # f32 accumulator
                     + 2 * tn * 4)                      # bias row
        cp_kwargs = dict(
            dimension_semantics=("parallel", "parallel", "arbitrary"))
        if vmem_need > 12 * 1024 * 1024:
            cp_kwargs["vmem_limit_bytes"] = int(vmem_need * 1.25)

        cost = pl.CostEstimate(
            flops=2 * Bp * OUTp * INp,
            transcendentals=0,
            bytes_accessed=(Bp * INp * dsize * grid_n      # x re-read per j
                            + INp * OUTp * dsize * grid_m  # w re-read per i
                            + Bp * OUTp * osize            # output write
                            + OUTp * 4))

        out_padded = pl.pallas_call(
            _linear_hsig_kernel,
            out_shape=jax.ShapeDtypeStruct((Bp, OUTp), out_dtype),
            grid_spec=pltpu.PrefetchScalarGridSpec(
                num_scalar_prefetch=0,
                grid=grid,
                in_specs=[
                    pl.BlockSpec((tm, tk), lambda i, j, k: (i, k)),  # x
                    pl.BlockSpec((tk, tn), lambda i, j, k: (k, j)),  # w (K, N)
                    pl.BlockSpec((1, tn), lambda i, j, k: (0, j)),   # bias row
                ],
                out_specs=pl.BlockSpec((tm, tn), lambda i, j, k: (i, j)),
                scratch_shapes=[pltpu.VMEM((tm, tn), jnp.float32)],
            ),
            compiler_params=pltpu.CompilerParams(**cp_kwargs),
            cost_estimate=cost,
        )(xp, self.w_kn, self.b_row)

        if (Bp, OUTp) != (B, OUT):
            out_padded = out_padded[:B, :OUT]
        return out_padded


if __name__ == "__main__":
    key = jax.random.PRNGKey(0)
    kx, kw, kb, kx2 = jax.random.split(key, 4)

    # Shapes implied by the module: Linear(8 -> 16) on a 2-D batch.
    B, IN, OUT = 8, 8, 16
    x = jax.random.normal(kx, (B, IN), dtype=jnp.float32)

    # Mimic torch.nn.Linear init: U(-1/sqrt(IN), 1/sqrt(IN)).
    bound = 1.0 / (IN ** 0.5)
    w = jax.random.uniform(kw, (OUT, IN), minval=-bound, maxval=bound,
                           dtype=jnp.float32)
    b = jax.random.uniform(kb, (OUT,), minval=-bound, maxval=bound,
                           dtype=jnp.float32)

    # Plain-JAX reference.
    ref = jnp.clip(x @ w.T + b + 3.0, 0.0, 6.0) / 6.0

    mod = LinearHardSigmoid(w, b)

    # 1) Default path: toy size triggers the small-problem bypass.
    out_fast = mod(x)
    jax.block_until_ready(out_fast)
    assert out_fast.shape == (B, OUT)
    assert jnp.allclose(out_fast, ref, atol=1e-5, rtol=1e-5)

    # 2) Forced Pallas path at the module shape (exercises the kernel).
    out_pallas = mod(x, force_pallas=True)
    jax.block_until_ready(out_pallas)
    assert out_pallas.shape == (B, OUT)
    assert jnp.allclose(out_pallas, ref, atol=1e-5, rtol=1e-5)

    # 3) Larger batch + bf16 operands (f32 accumulation/epilogue).
    B2 = 40
    x2 = jax.random.normal(kx2, (B2, IN), dtype=jnp.float32)
    ref2 = jnp.clip(x2 @ w.T + b + 3.0, 0.0, 6.0) / 6.0
    mod_bf16 = LinearHardSigmoid(w, b, compute_dtype=jnp.bfloat16)
    out2 = mod_bf16(x2, force_pallas=True)
    jax.block_until_ready(out2)
    assert out2.shape == (B2, OUT)
    assert jnp.allclose(out2, ref2, atol=5e-2, rtol=5e-2)

    print("KERNEL_OK")
</pallas_src>

<mosaic_0001>
module attributes {stable_mosaic.version = 11 : i64} {
  func.func @_linear_hsig_kernel(%arg0: i32, %arg1: i32, %arg2: i32, %arg3: memref<8x128xf32, #tpu.memory_space<vmem>>, %arg4: memref<128x128xf32, #tpu.memory_space<vmem>>, %arg5: memref<1x128xf32, #tpu.memory_space<vmem>>, %arg6: memref<8x128xf32, #tpu.memory_space<vmem>>, %arg7: memref<8x128xf32, #tpu.memory_space<vmem>>) attributes {dimension_semantics = [#tpu.dimension_semantics<parallel>, #tpu.dimension_semantics<parallel>, #tpu.dimension_semantics<arbitrary>], iteration_bounds = array<i64: 1, 1, 1>, scalar_prefetch = 0 : i64, scratch_operands = 1 : i64, tpu.core_type = #tpu.core_type<tc>, window_params = [{transform_indices = @transform_0, window_bounds = array<i64: 8, 128>}, {transform_indices = @transform_1, window_bounds = array<i64: 128, 128>}, {transform_indices = @transform_2, window_bounds = array<i64: 1, 128>}, {transform_indices = @transform_3, window_bounds = array<i64: 8, 128>}]} {
    %c0_i32 = arith.constant 0 : i32
    %0 = arith.cmpi eq, %arg2, %c0_i32 : i32
    %1 = arith.extui %0 : i1 to i32
    %c0_i32_0 = arith.constant 0 : i32
    %2 = arith.cmpi ne, %1, %c0_i32_0 : i32
    scf.if %2 {
      %cst_10 = arith.constant 0.000000e+00 : f32
      %12 = vector.broadcast %cst_10 : f32 to vector<8x128xf32>
      %c0_11 = arith.constant 0 : index
      %c0_12 = arith.constant 0 : index
      %13 = vector.load %arg7[%c0_11, %c0_12] : memref<8x128xf32, #tpu.memory_space<vmem>>, vector<8x128xf32>
      tpu.vector_store %arg7[%c0_11, %c0_12], %12 {strides = array<i32>} : memref<8x128xf32, #tpu.memory_space<vmem>>, vector<8x128xf32>,
    } else {
    }
    %c0 = arith.constant 0 : index
    %c0_1 = arith.constant 0 : index
    %3 = vector.load %arg7[%c0, %c0_1] : memref<8x128xf32, #tpu.memory_space<vmem>>, vector<8x128xf32>
    %c0_2 = arith.constant 0 : index
    %c0_3 = arith.constant 0 : index
    %4 = vector.load %arg3[%c0_2, %c0_3] : memref<8x128xf32, #tpu.memory_space<vmem>>, vector<8x128xf32>
    %c0_4 = arith.constant 0 : index
    %c0_5 = arith.constant 0 : index
    %5 = vector.load %arg4[%c0_4, %c0_5] : memref<128x128xf32, #tpu.memory_space<vmem>>, vector<128x128xf32>
    %cst = arith.constant dense<0.000000e+00> : vector<8x128xf32>
    %6 = tpu.matmul %4, %5, %cst {dimension_numbers = #tpu.dot_dimension_numbers<[1], [0], [0], [1], [0, 0, 1, 1], [], []>} : vector<8x128xf32>, vector<128x128xf32>, vector<8x128xf32> -> vector<8x128xf32>
    %7 = arith.addf %3, %6 : vector<8x128xf32>
    %c0_6 = arith.constant 0 : index
    %c0_7 = arith.constant 0 : index
    %8 = vector.load %arg7[%c0_6, %c0_7] : memref<8x128xf32, #tpu.memory_space<vmem>>, vector<8x128xf32>
    tpu.vector_store %arg7[%c0_6, %c0_7], %7 {strides = array<i32>} : memref<8x128xf32, #tpu.memory_space<vmem>>, vector<8x128xf32>,
    %c0_i32_8 = arith.constant 0 : i32
    %9 = arith.cmpi eq, %arg2, %c0_i32_8 : i32
    %10 = arith.extui %9 : i1 to i32
    %c0_i32_9 = arith.constant 0 : i32
    %11 = arith.cmpi ne, %10, %c0_i32_9 : i32
    scf.if %11 {
      %c0_10 = arith.constant 0 : index
      %c0_11 = arith.constant 0 : index
      %12 = vector.load %arg7[%c0_10, %c0_11] : memref<8x128xf32, #tpu.memory_space<vmem>>, vector<8x128xf32>
      %c0_12 = arith.constant 0 : index
      %c0_13 = arith.constant 0 : index
      %13 = vector.load %arg5[%c0_12, %c0_13] : memref<1x128xf32, #tpu.memory_space<vmem>>, vector<1x128xf32>
      %14 = vector.broadcast %13 : vector<1x128xf32> to vector<8x128xf32>
      %15 = arith.addf %12, %14 : vector<8x128xf32>
      %cst_14 = arith.constant 3.000000e+00 : f32
      %16 = vector.broadcast %cst_14 : f32 to vector<8x128xf32>
      %17 = arith.addf %15, %16 : vector<8x128xf32>
      %cst_15 = arith.constant 0.000000e+00 : f32
      %18 = vector.broadcast %cst_15 : f32 to vector<8x128xf32>
      %19 = arith.maximumf %17, %18 : vector<8x128xf32>
      %cst_16 = arith.constant 6.000000e+00 : f32
      %20 = vector.broadcast %cst_16 : f32 to vector<8x128xf32>
      %21 = arith.minimumf %19, %20 : vector<8x128xf32>
      %cst_17 = arith.constant 0.166666672 : f32
      %22 = vector.broadcast %cst_17 : f32 to vector<8x128xf32>
      %23 = arith.mulf %21, %22 : vector<8x128xf32>
      %c0_18 = arith.constant 0 : index
      %c0_19 = arith.constant 0 : index
      %24 = vector.load %arg6[%c0_18, %c0_19] : memref<8x128xf32, #tpu.memory_space<vmem>>, vector<8x128xf32>
      tpu.vector_store %arg6[%c0_18, %c0_19], %23 {strides = array<i32>} : memref<8x128xf32, #tpu.memory_space<vmem>>, vector<8x128xf32>,
    } else {
    }
    return
  }
  func.func @transform_0(%arg0: i32, %arg1: i32, %arg2: i32) -> (i32, i32) {
    %c0_i32 = arith.constant 0 : i32
    return %arg0, %arg2 : i32, i32
  }
  func.func @transform_1(%arg0: i32, %arg1: i32, %arg2: i32) -> (i32, i32) {
    %c0_i32 = arith.constant 0 : i32
    return %arg2, %arg1 : i32, i32
  }
  func.func @transform_2(%arg0: i32, %arg1: i32, %arg2: i32) -> (i32, i32) {
    %c0_i32 = arith.constant 0 : i32
    %c0_i32_0 = arith.constant 0 : i32
    return %c0_i32, %arg1 : i32, i32
  }
  func.func @transform_3(%arg0: i32, %arg1: i32, %arg2: i32) -> (i32, i32) {
    %c0_i32 = arith.constant 0 : i32
    return %arg0, %arg1 : i32, i32
  }
}

</mosaic_0001>

<bundles_post_ra>
// kernel: tpu_custom_call.1
= control target key start
LH: loop header
LB: loop body
LE: loop exit
PB: predicated region body
PF: predicated region fallthrough
CT: control target
= control target key end

     0   :  { %8 = vsyncpa [#allocation4], 0  ;;  %s400_s0 = inlined_call_operand.hbm [shape: f32[8,128], index: 0, kind: input, shape index: {}]   ;;  %s401_s1 = inlined_call_operand.hbm [shape: f32[128,128], index: 1, kind: input, shape index: {}]   ;;  %s402_s2 = inlined_call_operand.vmem [shape: f32[1,128], index: 2, kind: input, shape index: {}]   ;;  %s403_s3 = inlined_call_operand.hbm [shape: f32[8,128], index: 3, kind: output, shape index: {}]  }
   0x1   :  { %9 = vsyncpa [#allocation7], 0 }
   0x2   :  { %10 = vsyncpa [#allocation5], 0  ;;  %s326_s12 = smov [#allocation3]   ;;  %s327_s14 = smov [#allocation6]  }
   0x3   :  { %s17_s13 = sshll.u32 %s326_s12, 4  ;;  %s26_s15 = sshll.u32 %s327_s14, 4  ;;  %s18_s13 = int_to_ptr.vmem [resolvable:$true] %s17_s13  ;;  %s354_s15 = int_to_ptr.vmem [resolvable:$true] %s26_s15 }
   0x4   :  { %s254_s18 = scalar_lea.hbm %s400_s0, 128 }
   0x5   :  { %p255_p0 = scmp.ne.s32.totalorder %s400_s0, %s254_s18  ;;  %p258_p1 = scmp.lt.u32.totalorder %s254_s18, %s400_s0 }
   0x7   :  { %p260_p2 = pnand %p258_p1, %p255_p0 }
   0x9   :  { %263 = shalt.err (!%p260_p2)
}
   0xa   :  { %s264_s23 = scalar_lea.vmem %s18_s13, 128  ;;  %p269_p4 = scmp.lt.s32.totalorder %s18_s13, %s18_s13 }
   0xb   :  { %p265_p3 = scmp.ne.s32.totalorder %s18_s13, %s264_s23  ;;  %p270_p5 = scmp.lt.s32.totalorder %s264_s23, %s264_s23 }
   0xd   :  { %p271_p6 = por %p270_p5, %p269_p4 }
   0xf   :  { %p272_p7 = pnand %p271_p6, %p265_p3 }
  0x11   :  { %275 = shalt.err (!%p272_p7)
}
  0x12   :  { %20 = dma.hbm_to_vmem [thread:$0]  %s400_s0, 128, %s18_s13, [#allocation4]  }
  0x13   :  { %s276_s28 = scalar_lea.hbm %s401_s1, 2048 }
  0x14   :  { %p277_p8 = scmp.ne.s32.totalorder %s401_s1, %s276_s28  ;;  %p280_p9 = scmp.lt.u32.totalorder %s276_s28, %s401_s1 }
  0x16   :  { %p282_p10 = pnand %p280_p9, %p277_p8 }
  0x18   :  { %285 = shalt.err (!%p282_p10)
}
  0x19   :  { %s286_s6 = scalar_lea.vmem %s354_s15, 2048  ;;  %p291_p12 = scmp.lt.s32.totalorder %s354_s15, %s354_s15 }
  0x1a   :  { %p287_p11 = scmp.ne.s32.totalorder %s354_s15, %s286_s6  ;;  %p292_p13 = scmp.lt.s32.totalorder %s286_s6, %s286_s6 }
  0x1c   :  { %p293_p0 = por %p292_p13, %p291_p12 }
  0x1e   :  { %p294_p1 = pnand %p293_p0, %p287_p11 }
  0x20   :  { %297 = shalt.err (!%p294_p1)
}
  0x21   :  { %s328_s0 = smov 128   ;;  %s329_s7 = smov 8  }
  0x22   :  { %32 = dma.hbm_to_vmem [thread:$0]  %s401_s1, 2048, %s354_s15, [#allocation7], %s328_s0, %s328_s0, %s329_s7  }
  0x23   :  { %320 = dma.done.wait [#allocation4], 128  }
  0x24   :  { %321 = vsyncadd [#allocation4], 4294967168 }
  0x25   :  { %322 = dma.done.wait [#allocation7], 2048  }
  0x26   :  { %323 = vsyncadd [#allocation7], 4294965248  ;;  %v330_v0 = vmov 0.0|0.0   ;;  %vm331_vm0 = vmmov 0   ;;  %v332_v1 = vmov 0.0   ;;  %v48_v2 = vld [vmem:[#allocation6] sm:$0xff] }
  0x27   :  { %222 = vmatprep.subr.bf16.mxu0 %v330_v0  ;;  %219 = vmatprep.mubr.msk.f32.mxu0 %vm331_vm0, %v332_v1  ;;  %v49_v3 = vld [vmem:[#allocation6 + $0x8] sm:$0xff]  ;;  %v50_v4 = vld [vmem:[#allocation6 + $0x10] sm:$0xff]  ;;  %v51_v6 = vld [vmem:[#allocation6 + $0x18] sm:$0xff]  ;;  %s333_s11 = smov [#allocation8]  }
  0x28   :  { %v223_v5 = vpack.c.bf16 %v49_v3, %v48_v2  ;;  %v226_v7 = vpack.c.bf16 %v51_v6, %v50_v4  ;;  %v52_v8 = vld [vmem:[#allocation6 + $0x20] sm:$0xff]  ;;  %v53_v9 = vld [vmem:[#allocation6 + $0x28] sm:$0xff]  ;;  %v54_v11 = vld [vmem:[#allocation6 + $0x30] sm:$0xff]  ;;  %s159_s12 = sshll.u32 %s333_s11, 4  ;;  %s160_s12 = int_to_ptr.vmem [resolvable:$true] %s159_s12 }
  0x29   :  { %v229_v10 = vpack.c.bf16 %v53_v9, %v52_v8  ;;  %v55_v12 = vld [vmem:[#allocation6 + $0x38] sm:$0xff]  ;;  %v56_v14 = vld [vmem:[#allocation6 + $0x40] sm:$0xff]  ;;  %v57_v15 = vld [vmem:[#allocation6 + $0x48] sm:$0xff]  ;;  %s298_s13 = scalar_lea.vmem %s160_s12, 128  ;;  %p303_p3 = scmp.lt.s32.totalorder %s160_s12, %s160_s12 }
  0x2a   :  { %224 = vmatpush3.bf16.msra.mxu0 %v223_v5  ;;  %v232_v13 = vpack.c.bf16 %v55_v12, %v54_v11  ;;  %v235_v16 = vpack.c.bf16 %v57_v15, %v56_v14  ;;  %v58_v17 = vld [vmem:[#allocation6 + $0x50] sm:$0xff]  ;;  %v59_v18 = vld [vmem:[#allocation6 + $0x58] sm:$0xff]  ;;  %v60_v20 = vld [vmem:[#allocation6 + $0x60] sm:$0xff]  ;;  %p299_p2 = scmp.ne.s32.totalorder %s160_s12, %s298_s13  ;;  %p304_p4 = scmp.lt.s32.totalorder %s298_s13, %s298_s13 }
  0x2b   :  { %225 = vmatprep.subr.bf16.mxu0 %v330_v0  ;;  %v238_v19 = vpack.c.bf16 %v59_v18, %v58_v17  ;;  %v61_v21 = vld [vmem:[#allocation6 + $0x68] sm:$0xff]  ;;  %v62_v23 = vld [vmem:[#allocation6 + $0x70] sm:$0xff]  ;;  %v63_v24 = vld [vmem:[#allocation6 + $0x78] sm:$0xff] }
  0x2c   :  { %v241_v22 = vpack.c.bf16 %v61_v21, %v60_v20  ;;  %v244_v25 = vpack.c.bf16 %v63_v24, %v62_v23  ;;  %v47_v26 = vld [vmem:[#allocation3] sm:$0xff]  ;;  %p305_p5 = por %p304_p4, %p303_p3 }
  0x2d   :  { %v169_v27 = vld [vmem:[%s402_s2] ss:$0 sm:$0xff] }
  0x2e   :  { %227 = vmatpush3.bf16.msra.mxu0 %v226_v7  ;;  %p306_p6 = pnand %p305_p5, %p299_p2 }
  0x2f   :  { %228 = vmatprep.subr.bf16.mxu0 %v330_v0 }
  0x32   :  { %230 = vmatpush3.bf16.msra.mxu0 %v229_v10 }
  0x33   :  { %231 = vmatprep.subr.bf16.mxu0 %v330_v0 }
  0x36   :  { %233 = vmatpush3.bf16.msra.mxu0 %v232_v13 }
  0x37   :  { %234 = vmatprep.subr.bf16.mxu0 %v330_v0 }
  0x3a   :  { %236 = vmatpush3.bf16.msra.mxu0 %v235_v16 }
  0x3b   :  { %237 = vmatprep.subr.bf16.mxu0 %v330_v0 }
  0x3e   :  { %239 = vmatpush3.bf16.msra.mxu0 %v238_v19 }
  0x3f   :  { %240 = vmatprep.subr.bf16.mxu0 %v330_v0 }
  0x42   :  { %242 = vmatpush3.bf16.msra.mxu0 %v241_v22 }
  0x43   :  { %243 = vmatprep.subr.bf16.mxu0 %v330_v0 }
  0x46   :  { %245 = vmatpush3.bf16.msra.mxu0 %v244_v25 }
  0x49   :  { %220 = vmatmul.mubr.f32.vlgmr.msra.gmra.mrb[0].mxu0 %v47_v26 }
 0x11c   :  { %v130_v28 = vpop.f32.mrb[0].mxu0 }
 0x11d   :  { %v147_v29 = vadd.f32 %v169_v27, %v130_v28  ;;  %v221_v30 = vpop.f32.mrb[1].mxu0 }
 0x11f   :  { %v148_v31 = vadd.f32 3.0, %v147_v29 }
 0x121   :  { %v149_v32 = vmax.f32 %v148_v31, 0.0 }
 0x123   :  { %v150_v33 = vmin.f32 %v149_v32, 6.0 }
 0x125   :  { %v151_v34 = vmul.f32 0.16666667, %v150_v33 }
 0x127   :  { %152 = vst [vmem:[#allocation8] sm:$0xff] %v151_v34 }
 0x128   :  { %309 = shalt.err (!%p306_p6)
}
 0x129   :  { %s310_s15 = scalar_lea.hbm %s403_s3, 128 }
 0x12a   :  { %p311_p7 = scmp.ne.s32.totalorder %s403_s3, %s310_s15  ;;  %p314_p8 = scmp.lt.u32.totalorder %s310_s15, %s403_s3 }
 0x12c   :  { %p316_p9 = pnand %p314_p8, %p311_p7 }
 0x12e   :  { %319 = shalt.err (!%p316_p9)
}
 0x12f   :  { %162 = dma.vmem_to_hbm [thread:$0]  %s160_s12, 128, %s403_s3, [#allocation5]  }
 0x130   :  { %324 = dma.done.wait [#allocation5], 128  }
 0x131   :  { %325 = vsyncadd [#allocation5], 4294967168 }
 0x132   :  { %166 = vsyncpa [#allocation4], 1 }
 0x133   :  { %167 = vsyncpa [#allocation7], 1 }
 0x134   :  { %168 = vsyncpa [#allocation5], 1 }

</bundles_post_ra>
